<compile_context>
chip_gen: v5e
topology: v5e:2x2
jax: 0.10.0
libtpu: 0.0.40
codegen_flags: <defaults>
</compile_context>

<pallas_src>
import functools

import jax
import jax.numpy as jnp
from jax.experimental import pallas as pl
from jax.experimental.pallas import tpu as pltpu

_LANE = 128
_ROW_GRANULE = 32          # int8 native sublane packing -> keep row tiles 32-aligned


def _round_up(x, m):
    return (x + m - 1) // m * m


def _physical_vmem_bytes():
    try:
        info = pltpu.get_tpu_info()
        cap = getattr(info, "vmem_capacity_bytes", None)
        if cap:
            return int(cap)
    except Exception:
        pass
    return 64 * 1024 * 1024   # conservative default (v7x-sized)


def _vmem_config():
    phys = _physical_vmem_bytes()
    limit = min(int(phys * 0.8), 112 * 1024 * 1024)   # headroom for compiler scratch
    big = phys >= 96 * 1024 * 1024                    # v5e/v6e (128 MiB) vs v7x (64 MiB)
    row_cap = 512 if big else 256
    lane_cap = 1024 if big else 512
    return limit, row_cap, lane_cap


def _pick_tile(size_pad, cap, granule):
    """Largest multiple of `granule` that divides `size_pad` and is <= cap."""
    if size_pad <= cap:
        return size_pad
    t = (cap // granule) * granule
    while t > granule:
        if size_pad % t == 0:
            return t
        t -= granule
    return granule


def _tile_rows(rows_pad, cap):
    tile = _pick_tile(rows_pad, cap, _ROW_GRANULE)
    # v7x has 2 TensorCores sharing the 'parallel' axis; give it >=2 blocks when
    # possible (costs ~0.35us of per-step overhead on single-TC parts).
    if tile == rows_pad and rows_pad >= 2 * _ROW_GRANULE:
        tile = _pick_tile(rows_pad, rows_pad // 2, _ROW_GRANULE)
    return tile


def _row_pad_tile(n, cap):
    pad = _round_up(max(n, 1), _ROW_GRANULE)
    return pad, _tile_rows(pad, cap)


def _lane_pad_tile(n, cap):
    pad = _round_up(max(n, 1), _LANE)
    return pad, _pick_tile(pad, cap, _LANE)


def _fused_vmem_bytes(tm, ts, c_in_pad, c_out_pad):
    return (2 * tm * ts * 1               # T tile, int8, double-buffered
            + 2 * ts * c_in_pad * 4       # X tile, f32, double-buffered
            + 1 * c_in_pad * c_out_pad * 2  # W resident bf16, Buffered(1)
            + 1 * c_out_pad * 4             # b resident, Buffered(1)
            + 2 * tm * c_out_pad * 4      # out tile, f32, double-buffered
            + tm * c_in_pad * 4           # F accumulator scratch
            + tm * 4)                     # count scratch


def _resident_spec(block_shape, index_map):
    # Buffered(1): constant-index block does not need double buffering.
    try:
        return pl.BlockSpec(block_shape, index_map, pipeline_mode=pl.Buffered(1))
    except TypeError:
        return pl.BlockSpec(block_shape, index_map)


# ---------------------------------------------------------------------------
# Kernel bodies
# ---------------------------------------------------------------------------

def _agg_then_project_kernel(t_ref, x_ref, w_ref, b_ref, o_ref,
                             acc_ref, cnt_ref, *, use_mean):
    """Fused:  Y = ((T @ X) [/counts]) @ W + b    grid = (row tiles, S tiles)."""
    k = pl.program_id(1)

    @pl.when(k == 0)
    def _():
        acc_ref[...] = jnp.zeros_like(acc_ref)
        if use_mean:
            cnt_ref[...] = jnp.zeros_like(cnt_ref)

    t = t_ref[...].astype(jnp.float32)            # int8 0/1 -> exact
    acc_ref[...] += jnp.dot(t.astype(jnp.bfloat16),
                            x_ref[...].astype(jnp.bfloat16),
                            preferred_element_type=jnp.float32)
    if use_mean:
        cnt_ref[...] += jnp.sum(t, axis=-1, keepdims=True)

    @pl.when(k == pl.num_programs(1) - 1)
    def _():
        f = acc_ref[...]
        if use_mean:
            f = f / jnp.maximum(cnt_ref[...], 1.0)   # exact, finalize-only
        y = jnp.dot(f.astype(jnp.bfloat16), w_ref[...],
                    preferred_element_type=jnp.float32) + b_ref[...]
        o_ref[...] = y.astype(o_ref.dtype)


def _aggregate_kernel(t_ref, m_ref, *rest, use_mean, has_bias):
    """Y = (T @ M) [/counts] [+ b]     grid = (row tiles, col tiles, S tiles)."""
    if has_bias:
        b_ref, o_ref, acc_ref, cnt_ref = rest
    else:
        b_ref = None
        o_ref, acc_ref, cnt_ref = rest
    k = pl.program_id(2)

    @pl.when(k == 0)
    def _():
        acc_ref[...] = jnp.zeros_like(acc_ref)
        if use_mean:
            cnt_ref[...] = jnp.zeros_like(cnt_ref)

    t = t_ref[...].astype(jnp.float32)
    acc_ref[...] += jnp.dot(t.astype(jnp.bfloat16),
                            m_ref[...].astype(jnp.bfloat16),
                            preferred_element_type=jnp.float32)
    if use_mean:
        cnt_ref[...] += jnp.sum(t, axis=-1, keepdims=True)

    @pl.when(k == pl.num_programs(2) - 1)
    def _():
        y = acc_ref[...]
        if use_mean:
            y = y / jnp.maximum(cnt_ref[...], 1.0)
        if has_bias:
            y = y + b_ref[...]
        o_ref[...] = y.astype(o_ref.dtype)


def _project_kernel(a_ref, w_ref, *rest, has_bias):
    """Y = A @ W [+ b]    grid = (row tiles, C_out tiles, C_in tiles)."""
    if has_bias:
        b_ref, o_ref, acc_ref = rest
    else:
        b_ref = None
        o_ref, acc_ref = rest
    k = pl.program_id(2)

    @pl.when(k == 0)
    def _():
        acc_ref[...] = jnp.zeros_like(acc_ref)

    acc_ref[...] += jnp.dot(a_ref[...].astype(jnp.bfloat16),
                            w_ref[...].astype(jnp.bfloat16),
                            preferred_element_type=jnp.float32)

    @pl.when(k == pl.num_programs(2) - 1)
    def _():
        y = acc_ref[...]
        if has_bias:
            y = y + b_ref[...]
        o_ref[...] = y.astype(o_ref.dtype)


# ---------------------------------------------------------------------------
# pallas_call wrappers
# ---------------------------------------------------------------------------

def _agg_then_project(t_p, x_p, w_p, b_p, *, use_mean, rows_pad, tm, s_pad, ts,
                      c_in_pad, c_out_pad, vmem_limit):
    kernel = functools.partial(_agg_then_project_kernel, use_mean=use_mean)
    n_row_blocks = rows_pad // tm
    cost = pl.CostEstimate(
        flops=2 * rows_pad * s_pad * c_in_pad + 2 * rows_pad * c_in_pad * c_out_pad,
        transcendentals=0,
        bytes_accessed=int(t_p.size * 1
                           + x_p.size * x_p.dtype.itemsize * n_row_blocks
                           + w_p.size * 2 + b_p.size * 4
                           + rows_pad * c_out_pad * 4),
    )
    return pl.pallas_call(
        kernel,
        out_shape=jax.ShapeDtypeStruct((rows_pad, c_out_pad), jnp.float32),
        grid=(n_row_blocks, s_pad // ts),
        in_specs=[
            pl.BlockSpec((tm, ts), lambda i, k: (i, k)),           # T (int8)
            pl.BlockSpec((ts, c_in_pad), lambda i, k: (k, 0)),     # X (f32)
            _resident_spec((c_in_pad, c_out_pad), lambda i, k: (0, 0)),  # W (bf16)
            _resident_spec((1, c_out_pad), lambda i, k: (0, 0)),   # b (f32)
        ],
        out_specs=pl.BlockSpec((tm, c_out_pad), lambda i, k: (i, 0)),
        scratch_shapes=[pltpu.VMEM((tm, c_in_pad), jnp.float32),   # F accumulator
                        pltpu.VMEM((tm, 1), jnp.float32)],         # counts
        compiler_params=pltpu.CompilerParams(
            dimension_semantics=("parallel", "arbitrary"),
            vmem_limit_bytes=vmem_limit),
        cost_estimate=cost,
    )(t_p, x_p, w_p, b_p)


def _aggregate(t_p, m, b_p, *, use_mean, rows_pad, tm, s_pad, ts,
               cols_pad, tn, out_dtype, vmem_limit):
    has_bias = b_p is not None
    kernel = functools.partial(_aggregate_kernel, use_mean=use_mean,
                               has_bias=has_bias)
    in_specs = [
        pl.BlockSpec((tm, ts), lambda i, n, k: (i, k)),            # T (int8)
        pl.BlockSpec((ts, tn), lambda i, n, k: (k, n)),            # M
    ]
    args = [t_p, m]
    if has_bias:
        in_specs.append(pl.BlockSpec((1, tn), lambda i, n, k: (0, n)))
        args.append(b_p)
    out_itemsize = 2 if out_dtype == jnp.bfloat16 else 4
    cost = pl.CostEstimate(
        flops=2 * rows_pad * s_pad * cols_pad,
        transcendentals=0,
        bytes_accessed=int(t_p.size * 1 * (cols_pad // tn)
                           + m.size * m.dtype.itemsize * (rows_pad // tm)
                           + (b_p.size * 4 if has_bias else 0)
                           + rows_pad * cols_pad * out_itemsize),
    )
    return pl.pallas_call(
        kernel,
        out_shape=jax.ShapeDtypeStruct((rows_pad, cols_pad), out_dtype),
        grid=(rows_pad // tm, cols_pad // tn, s_pad // ts),
        in_specs=in_specs,
        out_specs=pl.BlockSpec((tm, tn), lambda i, n, k: (i, n)),
        scratch_shapes=[pltpu.VMEM((tm, tn), jnp.float32),
                        pltpu.VMEM((tm, 1), jnp.float32)],
        compiler_params=pltpu.CompilerParams(
            dimension_semantics=("parallel", "parallel", "arbitrary"),
            vmem_limit_bytes=vmem_limit),
        cost_estimate=cost,
    )(*args)


def _project(a, w_p, b_p, *, rows_pad, tr, c_red_pad, tk, c_out_pad, tn,
             out_dtype, vmem_limit):
    has_bias = b_p is not None
    kernel = functools.partial(_project_kernel, has_bias=has_bias)
    in_specs = [
        pl.BlockSpec((tr, tk), lambda i, n, k: (i, k)),            # A
        pl.BlockSpec((tk, tn), lambda i, n, k: (k, n)),            # W (bf16)
    ]
    args = [a, w_p]
    if has_bias:
        in_specs.append(pl.BlockSpec((1, tn), lambda i, n, k: (0, n)))
        args.append(b_p)
    out_itemsize = 2 if out_dtype == jnp.bfloat16 else 4
    cost = pl.CostEstimate(
        flops=2 * rows_pad * c_red_pad * c_out_pad,
        transcendentals=0,
        bytes_accessed=int(a.size * a.dtype.itemsize * (c_out_pad // tn)
                           + w_p.size * 2 * (rows_pad // tr)
                           + (b_p.size * 4 if has_bias else 0)
                           + rows_pad * c_out_pad * out_itemsize),
    )
    return pl.pallas_call(
        kernel,
        out_shape=jax.ShapeDtypeStruct((rows_pad, c_out_pad), out_dtype),
        grid=(rows_pad // tr, c_out_pad // tn, c_red_pad // tk),
        in_specs=in_specs,
        out_specs=pl.BlockSpec((tr, tn), lambda i, n, k: (i, n)),
        scratch_shapes=[pltpu.VMEM((tr, tn), jnp.float32)],
        compiler_params=pltpu.CompilerParams(
            dimension_semantics=("parallel", "parallel", "arbitrary"),
            vmem_limit_bytes=vmem_limit),
        cost_estimate=cost,
    )(*args)


# ---------------------------------------------------------------------------
# Public entry point
# ---------------------------------------------------------------------------

def lazy_transfer(features, transfer_map, w, b, *, use_mean=False,
                  _force_path=None):
    """LazyTransfer forward (ptensors0 -> ptensors0).

    features:     (S, C_in)  f32 — one row per source reference domain
    transfer_map: (T, S)     0/1 — connectivity from (target_domains, graph)
    w:            (C_in, C_out) f32, b: (C_out,) f32 (LazyLinear params)
    returns:      (T, C_out) f32
    """
    S, C_in = features.shape
    T, S2 = transfer_map.shape
    assert S2 == S
    C_in2, C_out = w.shape
    assert C_in2 == C_in

    vmem_limit, row_cap, lane_cap = _vmem_config()

    T_pad, tm = _row_pad_tile(T, row_cap)
    S_pad, ts = _lane_pad_tile(S, lane_cap)
    C_in_pad, tk = _lane_pad_tile(C_in, lane_cap)
    C_out_pad, tn = _lane_pad_tile(C_out, lane_cap)

    # Transfer map: single pad+cast pass writing int8 (4x less HBM than f32),
    # values 0/1 are exact; kernels widen in-register.
    t_p = transfer_map
    if (T_pad, S_pad) != (T, S):
        t_p = jnp.pad(t_p, ((0, T_pad - T), (0, S_pad - S)))
    t_p = t_p.astype(jnp.int8)

    # Features stay f32 in HBM (bf16 cast happens in-kernel); pad only if needed.
    x_p = features.astype(jnp.float32)
    if (S_pad, C_in_pad) != (S, C_in):
        x_p = jnp.pad(x_p, ((0, S_pad - S), (0, C_in_pad - C_in)))

    # W is small and (possibly) resident: store bf16 to halve its VMEM footprint.
    w_p = w
    if (C_in_pad, C_out_pad) != (C_in, C_out):
        w_p = jnp.pad(w_p, ((0, C_in_pad - C_in), (0, C_out_pad - C_out)))
    w_p = w_p.astype(jnp.bfloat16)

    b_p = jnp.pad(b.astype(jnp.float32),
                  (0, C_out_pad - C_out)).reshape(1, C_out_pad)

    # Static matmul-association dispatch (zero padding preserves semantics:
    # zero T rows/cols and zero feature/weight rows/cols contribute nothing).
    flops_agg_first = 2 * T_pad * S_pad * C_in_pad + 2 * T_pad * C_in_pad * C_out_pad
    flops_proj_first = 2 * S_pad * C_in_pad * C_out_pad + 2 * T_pad * S_pad * C_out_pad
    fused_fits = (_fused_vmem_bytes(tm, ts, C_in_pad, C_out_pad)
                  <= vmem_limit - 4 * 1024 * 1024)

    if _force_path is not None:
        path = _force_path
    elif flops_agg_first <= flops_proj_first:
        path = "fused" if fused_fits else "agg_first"
    else:
        path = "proj_first"

    out = None
    if path == "fused":
        try:
            out = _agg_then_project(
                t_p, x_p, w_p, b_p, use_mean=use_mean,
                rows_pad=T_pad, tm=tm, s_pad=S_pad, ts=ts,
                c_in_pad=C_in_pad, c_out_pad=C_out_pad, vmem_limit=vmem_limit)
        except Exception:
            # Safety net (e.g. Buffered(1) rejected by this build): fall back
            # to the fully tiled two-kernel path.
            path = "agg_first"

    if out is None:
        if path == "proj_first":
            # XW = X @ W (bf16 intermediate), then Y = (T @ XW)/counts + b.
            tr = _tile_rows(S_pad, row_cap)
            xw = _project(x_p, w_p, None, rows_pad=S_pad, tr=tr,
                          c_red_pad=C_in_pad, tk=tk, c_out_pad=C_out_pad, tn=tn,
                          out_dtype=jnp.bfloat16, vmem_limit=vmem_limit)
            out = _aggregate(t_p, xw, b_p, use_mean=use_mean,
                             rows_pad=T_pad, tm=tm, s_pad=S_pad, ts=ts,
                             cols_pad=C_out_pad, tn=tn, out_dtype=jnp.float32,
                             vmem_limit=vmem_limit)
        else:  # "agg_first": F = (T @ X)/counts, then Y = F @ W + b.
            f = _aggregate(t_p, x_p, None, use_mean=use_mean,
                           rows_pad=T_pad, tm=tm, s_pad=S_pad, ts=ts,
                           cols_pad=C_in_pad, tn=tk, out_dtype=jnp.bfloat16,
                           vmem_limit=vmem_limit)
            out = _project(f, w_p, b_p, rows_pad=T_pad, tr=tm,
                           c_red_pad=C_in_pad, tk=tk, c_out_pad=C_out_pad, tn=tn,
                           out_dtype=jnp.float32, vmem_limit=vmem_limit)

    return out[:T, :C_out]


def _reference(features, transfer_map, w, b, *, use_mean=False):
    f = transfer_map @ features
    if use_mean:
        counts = jnp.maximum(jnp.sum(transfer_map, axis=-1, keepdims=True), 1.0)
        f = f / counts
    return f @ w + b[None, :]


# ---------------------------------------------------------------------------
# Self-test
# ---------------------------------------------------------------------------

if __name__ == "__main__":
    def make_problem(key, S, T, C_in, C_out, fan=3):
        k_feat, k_w = jax.random.split(key)
        features = jax.random.normal(k_feat, (S, C_in), dtype=jnp.float32)
        tgt = jnp.arange(T)[:, None]
        src = jnp.arange(S)[None, :]
        conn = jnp.zeros((T, S), dtype=jnp.bool_)
        for d in range(fan):   # target j hears from sources {j, j+1, ..} mod S
            conn = conn | (src == ((tgt + d) % S))
        transfer_map = conn.astype(jnp.float32)
        bound = (6.0 / (C_in + C_out)) ** 0.5     # xavier_uniform
        w = jax.random.uniform(k_w, (C_in, C_out), minval=-bound, maxval=bound,
                               dtype=jnp.float32)
        b = jnp.zeros((C_out,), dtype=jnp.float32)   # LazyLinear zero-init bias
        return features, transfer_map, w, b

    key = jax.random.PRNGKey(0)
    k1, k2 = jax.random.split(key)

    # Case 1: few targets (fused aggregate+project path), sum and mean.
    feats, tmap, w, b = make_problem(k1, S=16, T=8, C_in=32, C_out=32)
    for use_mean in (False, True):
        out = jax.block_until_ready(
            lazy_transfer(feats, tmap, w, b, use_mean=use_mean))
        ref = _reference(feats, tmap, w, b, use_mean=use_mean)
        assert out.shape == (8, 32)
        assert jnp.allclose(out, ref, atol=5e-2, rtol=5e-2), (
            f"mismatch (use_mean={use_mean}): "
            f"max abs err {float(jnp.max(jnp.abs(out - ref)))}")

    # Case 2: many targets, few sources -> project-then-aggregate path.
    feats2, tmap2, w2, b2 = make_problem(k2, S=8, T=300, C_in=32, C_out=32)
    out2 = jax.block_until_ready(
        lazy_transfer(feats2, tmap2, w2, b2, use_mean=True))
    ref2 = _reference(feats2, tmap2, w2, b2, use_mean=True)
    assert out2.shape == (300, 32)
    assert jnp.allclose(out2, ref2, atol=5e-2, rtol=5e-2), (
        f"mismatch (proj_first): max abs err {float(jnp.max(jnp.abs(out2 - ref2)))}")

    # Case 3: force the unfused aggregate-then-project path (W-too-big fallback).
    out3 = jax.block_until_ready(
        lazy_transfer(feats, tmap, w, b, use_mean=True, _force_path="agg_first"))
    ref3 = _reference(feats, tmap, w, b, use_mean=True)
    assert jnp.allclose(out3, ref3, atol=5e-2, rtol=5e-2), (
        f"mismatch (agg_first): max abs err {float(jnp.max(jnp.abs(out3 - ref3)))}")

    print("KERNEL_OK")
</pallas_src>

<mosaic_0001>
module attributes {stable_mosaic.version = 11 : i64} {
  func.func @_agg_then_project_kernel(%arg0: i32, %arg1: i32, %arg2: memref<32x128xi8, #tpu.memory_space<vmem>>, %arg3: memref<128x128xf32, #tpu.memory_space<vmem>>, %arg4: memref<128x128xbf16, #tpu.memory_space<vmem>>, %arg5: memref<1x128xf32, #tpu.memory_space<vmem>>, %arg6: memref<32x128xf32, #tpu.memory_space<vmem>>, %arg7: memref<32x128xf32, #tpu.memory_space<vmem>>, %arg8: memref<32x1xf32, #tpu.memory_space<vmem>>) attributes {dimension_semantics = [#tpu.dimension_semantics<parallel>, #tpu.dimension_semantics<arbitrary>], iteration_bounds = array<i64: 1, 1>, scalar_prefetch = 0 : i64, scratch_operands = 2 : i64, tpu.core_type = #tpu.core_type<tc>, window_params = [{transform_indices = @transform_0, window_bounds = array<i64: 32, 128>}, {transform_indices = @transform_1, window_bounds = array<i64: 128, 128>}, {pipeline_mode = #tpu.pipeline_mode<synchronous>, transform_indices = @transform_2, window_bounds = array<i64: 128, 128>}, {pipeline_mode = #tpu.pipeline_mode<synchronous>, transform_indices = @transform_3, window_bounds = array<i64: 1, 128>}, {transform_indices = @transform_4, window_bounds = array<i64: 32, 128>}]} {
    %c0_i32 = arith.constant 0 : i32
    %0 = arith.cmpi eq, %arg1, %c0_i32 : i32
    %1 = arith.extui %0 : i1 to i32
    %c0_i32_0 = arith.constant 0 : i32
    %2 = arith.cmpi ne, %1, %c0_i32_0 : i32
    scf.if %2 {
      %cst_10 = arith.constant 0.000000e+00 : f32
      %15 = vector.broadcast %cst_10 : f32 to vector<32x128xf32>
      %c0_11 = arith.constant 0 : index
      %c0_12 = arith.constant 0 : index
      %16 = vector.load %arg7[%c0_11, %c0_12] : memref<32x128xf32, #tpu.memory_space<vmem>>, vector<32x128xf32>
      tpu.vector_store %arg7[%c0_11, %c0_12], %15 {strides = array<i32>} : memref<32x128xf32, #tpu.memory_space<vmem>>, vector<32x128xf32>,
    } else {
    }
    %c0 = arith.constant 0 : index
    %c0_1 = arith.constant 0 : index
    %3 = vector.load %arg2[%c0, %c0_1] : memref<32x128xi8, #tpu.memory_space<vmem>>, vector<32x128xi8>
    %4 = arith.sitofp %3 : vector<32x128xi8> to vector<32x128xf32>
    %c0_2 = arith.constant 0 : index
    %c0_3 = arith.constant 0 : index
    %5 = vector.load %arg7[%c0_2, %c0_3] : memref<32x128xf32, #tpu.memory_space<vmem>>, vector<32x128xf32>
    %6 = arith.truncf %4 : vector<32x128xf32> to vector<32x128xbf16>
    %c0_4 = arith.constant 0 : index
    %c0_5 = arith.constant 0 : index
    %7 = vector.load %arg3[%c0_4, %c0_5] : memref<128x128xf32, #tpu.memory_space<vmem>>, vector<128x128xf32>
    %8 = arith.truncf %7 : vector<128x128xf32> to vector<128x128xbf16>
    %cst = arith.constant dense<0.000000e+00> : vector<32x128xf32>
    %9 = tpu.matmul %6, %8, %cst {dimension_numbers = #tpu.dot_dimension_numbers<[1], [0], [0], [1], [0, 0, 1, 1], [], []>} : vector<32x128xbf16>, vector<128x128xbf16>, vector<32x128xf32> -> vector<32x128xf32>
    %10 = arith.addf %5, %9 : vector<32x128xf32>
    %c0_6 = arith.constant 0 : index
    %c0_7 = arith.constant 0 : index
    %11 = vector.load %arg7[%c0_6, %c0_7] : memref<32x128xf32, #tpu.memory_space<vmem>>, vector<32x128xf32>
    tpu.vector_store %arg7[%c0_6, %c0_7], %10 {strides = array<i32>} : memref<32x128xf32, #tpu.memory_space<vmem>>, vector<32x128xf32>,
    %c0_i32_8 = arith.constant 0 : i32
    %12 = arith.cmpi eq, %arg1, %c0_i32_8 : i32
    %13 = arith.extui %12 : i1 to i32
    %c0_i32_9 = arith.constant 0 : i32
    %14 = arith.cmpi ne, %13, %c0_i32_9 : i32
    scf.if %14 {
      %c0_10 = arith.constant 0 : index
      %c0_11 = arith.constant 0 : index
      %15 = vector.load %arg7[%c0_10, %c0_11] : memref<32x128xf32, #tpu.memory_space<vmem>>, vector<32x128xf32>
      %16 = arith.truncf %15 : vector<32x128xf32> to vector<32x128xbf16>
      %c0_12 = arith.constant 0 : index
      %c0_13 = arith.constant 0 : index
      %17 = vector.load %arg4[%c0_12, %c0_13] : memref<128x128xbf16, #tpu.memory_space<vmem>>, vector<128x128xbf16>
      %cst_14 = arith.constant dense<0.000000e+00> : vector<32x128xf32>
      %18 = tpu.matmul %16, %17, %cst_14 {dimension_numbers = #tpu.dot_dimension_numbers<[1], [0], [0], [1], [0, 0, 1, 1], [], []>} : vector<32x128xbf16>, vector<128x128xbf16>, vector<32x128xf32> -> vector<32x128xf32>
      %c0_15 = arith.constant 0 : index
      %c0_16 = arith.constant 0 : index
      %19 = vector.load %arg5[%c0_15, %c0_16] : memref<1x128xf32, #tpu.memory_space<vmem>>, vector<1x128xf32>
      %20 = vector.broadcast %19 : vector<1x128xf32> to vector<32x128xf32>
      %21 = arith.addf %18, %20 : vector<32x128xf32>
      %c0_17 = arith.constant 0 : index
      %c0_18 = arith.constant 0 : index
      %22 = vector.load %arg6[%c0_17, %c0_18] : memref<32x128xf32, #tpu.memory_space<vmem>>, vector<32x128xf32>
      tpu.vector_store %arg6[%c0_17, %c0_18], %21 {strides = array<i32>} : memref<32x128xf32, #tpu.memory_space<vmem>>, vector<32x128xf32>,
    } else {
    }
    return
  }
  func.func @transform_0(%arg0: i32, %arg1: i32) -> (i32, i32) {
    %c0_i32 = arith.constant 0 : i32
    return %arg0, %arg1 : i32, i32
  }
  func.func @transform_1(%arg0: i32, %arg1: i32) -> (i32, i32) {
    %c0_i32 = arith.constant 0 : i32
    %c0_i32_0 = arith.constant 0 : i32
    return %arg1, %c0_i32 : i32, i32
  }
  func.func @transform_2(%arg0: i32, %arg1: i32) -> (i32, i32) {
    %c0_i32 = arith.constant 0 : i32
    %c0_i32_0 = arith.constant 0 : i32
    %c0_i32_1 = arith.constant 0 : i32
    return %c0_i32, %c0_i32_0 : i32, i32
  }
  func.func @transform_3(%arg0: i32, %arg1: i32) -> (i32, i32) {
    %c0_i32 = arith.constant 0 : i32
    %c0_i32_0 = arith.constant 0 : i32
    %c0_i32_1 = arith.constant 0 : i32
    return %c0_i32, %c0_i32_0 : i32, i32
  }
  func.func @transform_4(%arg0: i32, %arg1: i32) -> (i32, i32) {
    %c0_i32 = arith.constant 0 : i32
    %c0_i32_0 = arith.constant 0 : i32
    return %arg0, %c0_i32 : i32, i32
  }
}

module attributes {stable_mosaic.version = 11 : i64} {
  func.func @_aggregate_kernel(%arg0: i32, %arg1: i32, %arg2: i32, %arg3: memref<32x128xi8, #tpu.memory_space<vmem>>, %arg4: memref<128x128xf32, #tpu.memory_space<vmem>>, %arg5: memref<32x128xbf16, #tpu.memory_space<vmem>>, %arg6: memref<32x128xf32, #tpu.memory_space<vmem>>, %arg7: memref<32x1xf32, #tpu.memory_space<vmem>>) attributes {dimension_semantics = [#tpu.dimension_semantics<parallel>, #tpu.dimension_semantics<parallel>, #tpu.dimension_semantics<arbitrary>], iteration_bounds = array<i64: 1, 1, 1>, scalar_prefetch = 0 : i64, scratch_operands = 2 : i64, tpu.core_type = #tpu.core_type<tc>, window_params = [{transform_indices = @transform_0, window_bounds = array<i64: 32, 128>}, {transform_indices = @transform_1, window_bounds = array<i64: 128, 128>}, {transform_indices = @transform_2, window_bounds = array<i64: 32, 128>}]} {
    %c0_i32 = arith.constant 0 : i32
    %0 = arith.cmpi eq, %arg2, %c0_i32 : i32
    %1 = arith.extui %0 : i1 to i32
    %c0_i32_0 = arith.constant 0 : i32
    %2 = arith.cmpi ne, %1, %c0_i32_0 : i32
    scf.if %2 {
      %cst_10 = arith.constant 0.000000e+00 : f32
      %15 = vector.broadcast %cst_10 : f32 to vector<32x128xf32>
      %c0_11 = arith.constant 0 : index
      %c0_12 = arith.constant 0 : index
      %16 = vector.load %arg6[%c0_11, %c0_12] : memref<32x128xf32, #tpu.memory_space<vmem>>, vector<32x128xf32>
      tpu.vector_store %arg6[%c0_11, %c0_12], %15 {strides = array<i32>} : memref<32x128xf32, #tpu.memory_space<vmem>>, vector<32x128xf32>,
    } else {
    }
    %c0 = arith.constant 0 : index
    %c0_1 = arith.constant 0 : index
    %3 = vector.load %arg3[%c0, %c0_1] : memref<32x128xi8, #tpu.memory_space<vmem>>, vector<32x128xi8>
    %4 = arith.sitofp %3 : vector<32x128xi8> to vector<32x128xf32>
    %c0_2 = arith.constant 0 : index
    %c0_3 = arith.constant 0 : index
    %5 = vector.load %arg6[%c0_2, %c0_3] : memref<32x128xf32, #tpu.memory_space<vmem>>, vector<32x128xf32>
    %6 = arith.truncf %4 : vector<32x128xf32> to vector<32x128xbf16>
    %c0_4 = arith.constant 0 : index
    %c0_5 = arith.constant 0 : index
    %7 = vector.load %arg4[%c0_4, %c0_5] : memref<128x128xf32, #tpu.memory_space<vmem>>, vector<128x128xf32>
    %8 = arith.truncf %7 : vector<128x128xf32> to vector<128x128xbf16>
    %cst = arith.constant dense<0.000000e+00> : vector<32x128xf32>
    %9 = tpu.matmul %6, %8, %cst {dimension_numbers = #tpu.dot_dimension_numbers<[1], [0], [0], [1], [0, 0, 1, 1], [], []>} : vector<32x128xbf16>, vector<128x128xbf16>, vector<32x128xf32> -> vector<32x128xf32>
    %10 = arith.addf %5, %9 : vector<32x128xf32>
    %c0_6 = arith.constant 0 : index
    %c0_7 = arith.constant 0 : index
    %11 = vector.load %arg6[%c0_6, %c0_7] : memref<32x128xf32, #tpu.memory_space<vmem>>, vector<32x128xf32>
    tpu.vector_store %arg6[%c0_6, %c0_7], %10 {strides = array<i32>} : memref<32x128xf32, #tpu.memory_space<vmem>>, vector<32x128xf32>,
    %c0_i32_8 = arith.constant 0 : i32
    %12 = arith.cmpi eq, %arg2, %c0_i32_8 : i32
    %13 = arith.extui %12 : i1 to i32
    %c0_i32_9 = arith.constant 0 : i32
    %14 = arith.cmpi ne, %13, %c0_i32_9 : i32
    scf.if %14 {
      %c0_10 = arith.constant 0 : index
      %c0_11 = arith.constant 0 : index
      %15 = vector.load %arg6[%c0_10, %c0_11] : memref<32x128xf32, #tpu.memory_space<vmem>>, vector<32x128xf32>
      %16 = arith.truncf %15 : vector<32x128xf32> to vector<32x128xbf16>
      %c0_12 = arith.constant 0 : index
      %c0_13 = arith.constant 0 : index
      %17 = vector.load %arg5[%c0_12, %c0_13] : memref<32x128xbf16, #tpu.memory_space<vmem>>, vector<32x128xbf16>
      tpu.vector_store %arg5[%c0_12, %c0_13], %16 {strides = array<i32>} : memref<32x128xbf16, #tpu.memory_space<vmem>>, vector<32x128xbf16>,
    } else {
    }
    return
  }
  func.func @transform_0(%arg0: i32, %arg1: i32, %arg2: i32) -> (i32, i32) {
    %c0_i32 = arith.constant 0 : i32
    return %arg0, %arg2 : i32, i32
  }
  func.func @transform_1(%arg0: i32, %arg1: i32, %arg2: i32) -> (i32, i32) {
    %c0_i32 = arith.constant 0 : i32
    return %arg2, %arg1 : i32, i32
  }
  func.func @transform_2(%arg0: i32, %arg1: i32, %arg2: i32) -> (i32, i32) {
    %c0_i32 = arith.constant 0 : i32
    return %arg0, %arg1 : i32, i32
  }
}

</mosaic_0001>

<bundles_post_ra>
// kernel: tpu_custom_call.1
= control target key start
LH: loop header
LB: loop body
LE: loop exit
PB: predicated region body
PF: predicated region fallthrough
CT: control target
= control target key end

     0   :  { %9 = vsyncpa [#allocation5], 0  ;;  %s478_s0 = inlined_call_operand.hbm [shape: s8[32,128], index: 0, kind: input, shape index: {}]   ;;  %s479_s1 = inlined_call_operand.hbm [shape: f32[128,128], index: 1, kind: input, shape index: {}]   ;;  %s480_s2 = inlined_call_operand.hbm [shape: bf16[128,128], index: 2, kind: input, shape index: {}]   ;;  %s481_s3 = inlined_call_operand.vmem [shape: f32[1,128], index: 3, kind: input, shape index: {}]   ;;  %s482_s4 = inlined_call_operand.hbm [shape: f32[32,128], index: 4, kind: output, shape index: {}]  }
   0x1   :  { %10 = vsyncpa [#allocation8], 0  ;;  %s27_s17 = sshll.u32 %s479_s1, 4  ;;  %s28_s17 = int_to_ptr.hbm [resolvable:$true] %s27_s17 }
   0x2   :  { %11 = vsyncpa [#allocation6], 0  ;;  %s424_s18 = smov [#allocation7]   ;;  %s17_s22 = sshll.u32 %s478_s0, 4  ;;  %s18_s22 = int_to_ptr.hbm [resolvable:$true] %s17_s22 }
   0x3   :  { %s29_s19 = sshll.u32 %s424_s18, 4  ;;  %s425_s23 = smov 128   ;;  %s30_s19 = int_to_ptr.vmem [resolvable:$true] %s29_s19 }
   0x4   :  { %s426_s24 = smov 8   ;;  %s427_s25 = smov [#allocation4]  }
   0x5   :  { %35 = dma.hbm_to_vmem [thread:$0]  %s28_s17, 2048, %s30_s19, [#allocation8], %s425_s23, %s425_s23, %s426_s24  }
   0x6   :  { %s19_s26 = sshll.u32 %s427_s25, 4  ;;  %s40_s28 = sshll.u32 %s480_s2, 4  ;;  %s20_s26 = int_to_ptr.vmem [resolvable:$true] %s19_s26  ;;  %s41_s28 = int_to_ptr.hbm [resolvable:$true] %s40_s28 }
   0x7   :  { %22 = dma.hbm_to_vmem [thread:$0]  %s18_s22, 128, %s20_s26, [#allocation5]  }
   0x8   :  { %s428_s29 = smov [#allocation9]   ;;  %s429_s0 = smov 64  }
   0x9   :  { %s42_s30 = sshll.u32 %s428_s29, 4  ;;  %s430_s5 = smov 4   ;;  %s43_s30 = int_to_ptr.vmem [resolvable:$true] %s42_s30 }
   0xa   :  { %48 = dma.hbm_to_vmem [thread:$0]  %s41_s28, 1024, %s43_s30, [#allocation8], %s429_s0, %s429_s0, %s430_s5  }
   0xb   :  { %418 = dma.done.wait [#allocation5], 128  }
   0xc   :  { %419 = vsyncadd [#allocation5], 4294967168 }
   0xd   :  { %420 = dma.done.wait [#allocation8], 3072  }
   0xe   :  { %421 = vsyncadd [#allocation8], 4294964224  ;;  %v100_v0 = vld [vmem:[#allocation7 + $0x70] sm:$0xff]  ;;  %v101_v1 = vld [vmem:[#allocation7 + $0x78] sm:$0xff]  ;;  %s431_s7 = smov [#allocation10]   ;;  %s243_s11 = sshll.u32 %s482_s4, 4  ;;  %s244_s11 = int_to_ptr.hbm [resolvable:$true] %s243_s11 }
   0xf   :  { %v98_v2 = vld [vmem:[#allocation7 + $0x60] sm:$0xff]  ;;  %v109_v3 = vpack.c.bf16 %v101_v1, %v100_v0  ;;  %v99_v4 = vld [vmem:[#allocation7 + $0x68] sm:$0xff]  ;;  %v96_v6 = vld [vmem:[#allocation7 + $0x50] sm:$0xff]  ;;  %s241_s8 = sshll.u32 %s431_s7, 4  ;;  %s242_s8 = int_to_ptr.vmem [resolvable:$true] %s241_s8 }
  0x10   :  { %v108_v5 = vpack.c.bf16 %v99_v4, %v98_v2  ;;  %v97_v7 = vld [vmem:[#allocation7 + $0x58] sm:$0xff]  ;;  %v94_v10 = vld [vmem:[#allocation7 + $0x40] sm:$0xff]  ;;  %v95_v11 = vld [vmem:[#allocation7 + $0x48] sm:$0xff] }
  0x11   :  { %110 = vmatpush.bf16.msra.mxu0 %v109_v3  ;;  %297 = vmatpush.bf16.msra.mxu2 %v109_v3  ;;  %v296_v8 = vld [vmem:[#allocation9 + $0x38] sm:$0xff]  ;;  %v107_v9 = vpack.c.bf16 %v97_v7, %v96_v6  ;;  %v295_v12 = vld [vmem:[#allocation9 + $0x30] sm:$0xff]  ;;  %v106_v13 = vpack.c.bf16 %v95_v11, %v94_v10  ;;  %v294_v16 = vld [vmem:[#allocation9 + $0x28] sm:$0xff] }
  0x12   :  { %214 = vmatpush.bf16.msra.mxu1 %v296_v8  ;;  %305 = vmatpush.bf16.msra.mxu3 %v296_v8  ;;  %v92_v14 = vld [vmem:[#allocation7 + $0x30] sm:$0xff]  ;;  %v93_v15 = vld [vmem:[#allocation7 + $0x38] sm:$0xff]  ;;  %v90_v18 = vld [vmem:[#allocation7 + $0x20] sm:$0xff] }
  0x13   :  { %v105_v17 = vpack.c.bf16 %v93_v15, %v92_v14  ;;  %v91_v19 = vld [vmem:[#allocation7 + $0x28] sm:$0xff]  ;;  %v293_v20 = vld [vmem:[#allocation9 + $0x20] sm:$0xff]  ;;  %v71_v22 = vld [vmem:[#allocation4] sm:$0xff] }
  0x14   :  { %v104_v21 = vpack.c.bf16 %v91_v19, %v90_v18  ;;  %v88_v23 = vld [vmem:[#allocation7 + $0x10] sm:$0xff]  ;;  %v89_v24 = vld [vmem:[#allocation7 + $0x18] sm:$0xff]  ;;  %v76_v26 = vunpack.c.0.s8 %v71_v22  ;;  %v77_v27 = vunpack.c.1.s8 %v71_v22  ;;  %v78_v28 = vunpack.c.2.s8 %v71_v22  ;;  %v86_v31 = vld [vmem:[#allocation7] sm:$0xff] }
  0x15   :  { %111 = vmatpush.bf16.msra.mxu0 %v108_v5  ;;  %298 = vmatpush.bf16.msra.mxu2 %v108_v5  ;;  %v292_v25 = vld [vmem:[#allocation9 + $0x18] sm:$0xff]  ;;  %v79_v29 = vunpack.c.3.s8 %v71_v22  ;;  %v103_v30 = vpack.c.bf16 %v89_v24, %v88_v23  ;;  %v87_v32 = vld [vmem:[#allocation7 + $0x8] sm:$0xff]  ;;  %v291_v40 = vld [vmem:[#allocation9 + $0x10] sm:$0xff] }
  0x16   :  { %215 = vmatpush.bf16.msra.mxu1 %v295_v12  ;;  %306 = vmatpush.bf16.msra.mxu3 %v295_v12  ;;  %v80_v33 = vcvt.s32.f32 %v76_v26  ;;  %v81_v34 = vcvt.s32.f32 %v77_v27  ;;  %v82_v35 = vcvt.s32.f32 %v78_v28  ;;  %v102_v37 = vpack.c.bf16 %v87_v32, %v86_v31  ;;  %v290_v41 = vld [vmem:[#allocation9 + $0x8] sm:$0xff]  ;;  %v289_v42 = vld [vmem:[#allocation9] sm:$0xff]  ;;  %v321_v49 = vld [vmem:[%s481_s3] ss:$0 sm:$0xff] }
  0x17   :  { %v83_v36 = vcvt.s32.f32 %v79_v29 }
  0x18   :  { %v84_v38 = vpack.c.bf16 %v81_v34, %v80_v33 }
  0x19   :  { %112 = vmatpush.bf16.msra.mxu0 %v107_v9  ;;  %299 = vmatpush.bf16.msra.mxu2 %v107_v9  ;;  %v85_v39 = vpack.c.bf16 %v83_v36, %v82_v35 }
  0x1a   :  { %216 = vmatpush.bf16.msra.mxu1 %v294_v16  ;;  %307 = vmatpush.bf16.msra.mxu3 %v294_v16 }
  0x1d   :  { %113 = vmatpush.bf16.msra.mxu0 %v106_v13  ;;  %300 = vmatpush.bf16.msra.mxu2 %v106_v13 }
  0x1e   :  { %217 = vmatpush.bf16.msra.mxu1 %v293_v20  ;;  %308 = vmatpush.bf16.msra.mxu3 %v293_v20 }
  0x21   :  { %114 = vmatpush.bf16.msra.mxu0 %v105_v17  ;;  %301 = vmatpush.bf16.msra.mxu2 %v105_v17 }
  0x22   :  { %218 = vmatpush.bf16.msra.mxu1 %v292_v25  ;;  %309 = vmatpush.bf16.msra.mxu3 %v292_v25 }
  0x25   :  { %115 = vmatpush.bf16.msra.mxu0 %v104_v21  ;;  %302 = vmatpush.bf16.msra.mxu2 %v104_v21 }
  0x26   :  { %219 = vmatpush.bf16.msra.mxu1 %v291_v40  ;;  %310 = vmatpush.bf16.msra.mxu3 %v291_v40 }
  0x29   :  { %116 = vmatpush.bf16.msra.mxu0 %v103_v30  ;;  %303 = vmatpush.bf16.msra.mxu2 %v103_v30 }
  0x2a   :  { %220 = vmatpush.bf16.msra.mxu1 %v290_v41  ;;  %311 = vmatpush.bf16.msra.mxu3 %v290_v41 }
  0x2d   :  { %117 = vmatpush.bf16.msra.mxu0 %v102_v37  ;;  %304 = vmatpush.bf16.msra.mxu2 %v102_v37 }
  0x2e   :  { %221 = vmatpush.bf16.msra.mxu1 %v289_v42  ;;  %312 = vmatpush.bf16.msra.mxu3 %v289_v42 }
  0x30   :  { %118 = vmatmul.bf16.vlgmr.msra.gmra.mxu0 %v84_v38  ;;  %123 = vmatmul.bf16.vlgmr.msra.gmra.mxu2 %v85_v39 }
  0xad   :  { %v119_v43 = vpop.f32.mrf.mxu0 }
  0xb3   :  { %v124_v44 = vpop.f32.mrf.mxu2 }
  0xb5   :  { %v121_v45 = vpop.f32.mrf.mxu0 }
  0xb6   :  { %v144_v46 = vpack.c.bf16 %v121_v45, %v119_v43 }
  0xb8   :  { %222 = vmatmul.bf16.vlgmr.msra.gmra.mxu1 %v144_v46 }
  0xbb   :  { %v126_v47 = vpop.f32.mrf.mxu2 }
  0xbc   :  { %v145_v48 = vpack.c.bf16 %v126_v47, %v124_v44 }
  0xbe   :  { %227 = vmatmul.bf16.vlgmr.msra.gmra.mxu3 %v145_v48 }
 0x135   :  { %v223_v50 = vpop.f32.mrf.mxu1 }
 0x136   :  { %v224_v51 = vadd.f32 %v321_v49, %v223_v50 }
 0x138   :  { %233 = vst [vmem:[#allocation10] sm:$0xff] %v224_v51 }
 0x13d   :  { %v225_v52 = vpop.f32.mrf.mxu1 }
 0x13e   :  { %v226_v53 = vadd.f32 %v321_v49, %v225_v52 }
 0x140   :  { %234 = vst [vmem:[#allocation10 + $0x8] sm:$0xff] %v226_v53 }
 0x141   :  { %v228_v54 = vpop.f32.mrf.mxu3 }
 0x142   :  { %v229_v55 = vadd.f32 %v321_v49, %v228_v54 }
 0x144   :  { %235 = vst [vmem:[#allocation10 + $0x10] sm:$0xff] %v229_v55 }
 0x149   :  { %v230_v56 = vpop.f32.mrf.mxu3 }
 0x14a   :  { %v231_v57 = vadd.f32 %v321_v49, %v230_v56 }
 0x14c   :  { %236 = vst [vmem:[#allocation10 + $0x18] sm:$0xff] %v231_v57 }
 0x14d   :  { %249 = dma.vmem_to_hbm [thread:$0]  %s242_s8, 512, %s244_s11, [#allocation6], %s425_s23, %s425_s23, %s426_s24  }
 0x14e   :  { %422 = dma.done.wait [#allocation6], 512  }
 0x14f   :  { %423 = vsyncadd [#allocation6], 4294966784 }
 0x150   :  { %254 = vsyncpa [#allocation5], 1 }
 0x151   :  { %255 = vsyncpa [#allocation8], 1 }
 0x152   :  { %256 = vsyncpa [#allocation6], 1 }

// kernel: tpu_custom_call.1
= control target key start
LH: loop header
LB: loop body
LE: loop exit
PB: predicated region body
PF: predicated region fallthrough
CT: control target
= control target key end

     0   :  { %7 = vsyncpa [#allocation5], 0  ;;  %s286_s0 = inlined_call_operand.hbm [shape: s8[32,128], index: 0, kind: input, shape index: {}]   ;;  %s287_s1 = inlined_call_operand.hbm [shape: f32[128,128], index: 1, kind: input, shape index: {}]   ;;  %s288_s2 = inlined_call_operand.hbm [shape: bf16[32,128], index: 2, kind: output, shape index: {}]  }
   0x1   :  { %8 = vsyncpa [#allocation8], 0 }
   0x2   :  { %9 = vsyncpa [#allocation6], 0  ;;  %s15_s11 = sshll.u32 %s286_s0, 4  ;;  %s255_s12 = smov [#allocation4]   ;;  %s16_s11 = int_to_ptr.hbm [resolvable:$true] %s15_s11 }
   0x3   :  { %s17_s13 = sshll.u32 %s255_s12, 4  ;;  %s25_s16 = sshll.u32 %s287_s1, 4  ;;  %s18_s13 = int_to_ptr.vmem [resolvable:$true] %s17_s13  ;;  %s26_s16 = int_to_ptr.hbm [resolvable:$true] %s25_s16 }
   0x4   :  { %20 = dma.hbm_to_vmem [thread:$0]  %s16_s11, 128, %s18_s13, [#allocation5]  }
   0x5   :  { %s256_s17 = smov [#allocation7]   ;;  %s257_s19 = smov 128  }
   0x6   :  { %s27_s18 = sshll.u32 %s256_s17, 4  ;;  %s258_s20 = smov 8   ;;  %s28_s18 = int_to_ptr.vmem [resolvable:$true] %s27_s18 }
   0x7   :  { %33 = dma.hbm_to_vmem [thread:$0]  %s26_s16, 2048, %s28_s18, [#allocation8], %s257_s19, %s257_s19, %s258_s20  }
   0x8   :  { %249 = dma.done.wait [#allocation5], 128  }
   0x9   :  { %250 = vsyncadd [#allocation5], 4294967168 }
   0xa   :  { %251 = dma.done.wait [#allocation8], 2048  }
   0xb   :  { %252 = vsyncadd [#allocation8], 4294965248  ;;  %v79_v0 = vld [vmem:[#allocation7 + $0x70] sm:$0xff]  ;;  %v80_v1 = vld [vmem:[#allocation7 + $0x78] sm:$0xff]  ;;  %s259_s0 = smov [#allocation9]   ;;  %s137_s23 = sshll.u32 %s288_s2, 4  ;;  %s138_s23 = int_to_ptr.hbm [resolvable:$true] %s137_s23 }
   0xc   :  { %v77_v2 = vld [vmem:[#allocation7 + $0x60] sm:$0xff]  ;;  %v88_v3 = vpack.c.bf16 %v80_v1, %v79_v0  ;;  %v78_v4 = vld [vmem:[#allocation7 + $0x68] sm:$0xff]  ;;  %v75_v6 = vld [vmem:[#allocation7 + $0x50] sm:$0xff]  ;;  %s135_s1 = sshll.u32 %s259_s0, 4  ;;  %s260_s24 = smov 64   ;;  %s136_s1 = int_to_ptr.vmem [resolvable:$true] %s135_s1 }
   0xd   :  { %v87_v5 = vpack.c.bf16 %v78_v4, %v77_v2  ;;  %v76_v7 = vld [vmem:[#allocation7 + $0x58] sm:$0xff]  ;;  %v73_v9 = vld [vmem:[#allocation7 + $0x40] sm:$0xff]  ;;  %v74_v10 = vld [vmem:[#allocation7 + $0x48] sm:$0xff]  ;;  %s261_s25 = smov 4  }
   0xe   :  { %89 = vmatpush.bf16.msra.mxu0 %v88_v3  ;;  %162 = vmatpush.bf16.msra.mxu1 %v88_v3  ;;  %v86_v8 = vpack.c.bf16 %v76_v7, %v75_v6  ;;  %v85_v11 = vpack.c.bf16 %v74_v10, %v73_v9  ;;  %v71_v12 = vld [vmem:[#allocation7 + $0x30] sm:$0xff]  ;;  %v72_v13 = vld [vmem:[#allocation7 + $0x38] sm:$0xff]  ;;  %v69_v15 = vld [vmem:[#allocation7 + $0x20] sm:$0xff] }
   0xf   :  { %v84_v14 = vpack.c.bf16 %v72_v13, %v71_v12  ;;  %v70_v16 = vld [vmem:[#allocation7 + $0x28] sm:$0xff]  ;;  %v50_v18 = vld [vmem:[#allocation4] sm:$0xff]  ;;  %v67_v19 = vld [vmem:[#allocation7 + $0x10] sm:$0xff] }
  0x10   :  { %v83_v17 = vpack.c.bf16 %v70_v16, %v69_v15  ;;  %v68_v20 = vld [vmem:[#allocation7 + $0x18] sm:$0xff]  ;;  %v55_v21 = vunpack.c.0.s8 %v50_v18  ;;  %v56_v22 = vunpack.c.1.s8 %v50_v18  ;;  %v57_v23 = vunpack.c.2.s8 %v50_v18  ;;  %v65_v26 = vld [vmem:[#allocation7] sm:$0xff]  ;;  %v66_v27 = vld [vmem:[#allocation7 + $0x8] sm:$0xff] }
  0x11   :  { %v58_v24 = vunpack.c.3.s8 %v50_v18  ;;  %v82_v25 = vpack.c.bf16 %v68_v20, %v67_v19  ;;  %v81_v32 = vpack.c.bf16 %v66_v27, %v65_v26 }
  0x12   :  { %90 = vmatpush.bf16.msra.mxu0 %v87_v5  ;;  %163 = vmatpush.bf16.msra.mxu1 %v87_v5  ;;  %v59_v28 = vcvt.s32.f32 %v55_v21  ;;  %v60_v29 = vcvt.s32.f32 %v56_v22  ;;  %v61_v30 = vcvt.s32.f32 %v57_v23 }
  0x13   :  { %v62_v31 = vcvt.s32.f32 %v58_v24 }
  0x14   :  { %v63_v33 = vpack.c.bf16 %v60_v29, %v59_v28 }
  0x15   :  { %v64_v34 = vpack.c.bf16 %v62_v31, %v61_v30 }
  0x16   :  { %91 = vmatpush.bf16.msra.mxu0 %v86_v8  ;;  %164 = vmatpush.bf16.msra.mxu1 %v86_v8 }
  0x1a   :  { %92 = vmatpush.bf16.msra.mxu0 %v85_v11  ;;  %165 = vmatpush.bf16.msra.mxu1 %v85_v11 }
  0x1e   :  { %93 = vmatpush.bf16.msra.mxu0 %v84_v14  ;;  %166 = vmatpush.bf16.msra.mxu1 %v84_v14 }
  0x22   :  { %94 = vmatpush.bf16.msra.mxu0 %v83_v17  ;;  %167 = vmatpush.bf16.msra.mxu1 %v83_v17 }
  0x26   :  { %95 = vmatpush.bf16.msra.mxu0 %v82_v25  ;;  %168 = vmatpush.bf16.msra.mxu1 %v82_v25 }
  0x2a   :  { %96 = vmatpush.bf16.msra.mxu0 %v81_v32  ;;  %169 = vmatpush.bf16.msra.mxu1 %v81_v32 }
  0x2d   :  { %97 = vmatmul.bf16.vlgmr.msra.gmra.mxu0 %v63_v33  ;;  %102 = vmatmul.bf16.vlgmr.msra.gmra.mxu1 %v64_v34 }
  0xaa   :  { %v98_v35 = vpop.f32.mrf.mxu0  ;;  %v103_v36 = vpop.f32.mrf.mxu1 }
  0xb2   :  { %v100_v37 = vpop.f32.mrf.mxu0  ;;  %v105_v38 = vpop.f32.mrf.mxu1 }
  0xb3   :  { %v154_v39 = vpack.c.bf16 %v100_v37, %v98_v35  ;;  %v159_v40 = vpack.c.bf16 %v105_v38, %v103_v36 }
  0xb5   :  { %155 = vst [vmem:[#allocation9] sm:$0xff] %v154_v39  }
  0xb6   :  { %161 = vst [vmem:[#allocation9 + $0x8] sm:$0xff] %v159_v40  }
  0xb7   :  { %143 = dma.vmem_to_hbm [thread:$0]  %s136_s1, 256, %s138_s23, [#allocation6], %s260_s24, %s260_s24, %s261_s25  }
  0xb8   :  { %253 = dma.done.wait [#allocation6], 256  }
  0xb9   :  { %254 = vsyncadd [#allocation6], 4294967040 }
  0xba   :  { %148 = vsyncpa [#allocation5], 1 }
  0xbb   :  { %149 = vsyncpa [#allocation8], 1 }
  0xbc   :  { %150 = vsyncpa [#allocation6], 1 }

</bundles_post_ra>
